<compile_context>
chip_gen: v7x
topology: tpu7x:2x2x1
jax: 0.10.0
libtpu: 0.0.40
codegen_flags: <defaults>
</compile_context>

<pallas_src>
import functools

import jax
import jax.numpy as jnp
from jax import lax
from jax.experimental import pallas as pl
from jax.experimental.pallas import tpu as pltpu


def _random_vq_kernel(xt_ref, pct_ref, cbt_ref, g_ref, csq_ref,
                      zqt_ref, idx_ref, loss_ref):
    """One grid step quantizes a (D, tile) slab of tokens (tokens on lanes).

    Every matmul is in MXU-native form (LHS contracts its last dim, RHS its
    first), all intermediates keep tokens on the 128-wide lane axis, and both
    the z_q and index stores are lane-dense -- no in-kernel transposes.
    """
    x_t = xt_ref[...]                  # (D, tile)  tokens on lanes
    pc_t = pct_ref[...]                # (K, D)     = (P @ C^T)^T = C @ P^T
    cb_t = cbt_ref[...]                # (E, K)     codebook^T
    g = g_ref[...]                     # (D, D)     = P @ P^T
    c_sq = csq_ref[...]                # (K, 1)     |c_k|^2

    K = pc_t.shape[0]
    tile = x_t.shape[1]

    # score[k, t] = |c_k|^2 - 2 <c_k, P^T x_t>.  |xp_t|^2 is constant across
    # codes, so it is dropped from the argmin and added back only for the loss.
    cross_t = jnp.dot(pc_t, x_t, preferred_element_type=jnp.float32)    # (K, tile)
    scores = c_sq - 2.0 * cross_t                                       # (K, tile)

    # argmin over codes (first index achieving the min, like torch.argmin),
    # produced lane-dense as (1, tile).  Fill value K-1 doubles as a NaN clamp.
    min_s = jnp.min(scores, axis=0, keepdims=True)                      # (1, tile)
    iota_k = lax.broadcasted_iota(jnp.int32, (K, tile), 0)              # (K, tile)
    cand = jnp.where(scores <= min_s, iota_k, K - 1)
    idx_row = jnp.min(cand, axis=0, keepdims=True)                      # (1, tile)
    idx_ref[...] = idx_row                                              # lane-dense store

    # z_q gather with tokens still on lanes -> lane-dense (E, tile) store.
    onehot_t = (iota_k == idx_row).astype(jnp.float32)                  # (K, tile)
    if K <= 2:
        # tiny codebook: VPU select/accumulate beats a contraction-2 MXU matmul
        zq_t = onehot_t[0:1, :] * cb_t[:, 0:1]
        for k in range(1, K):
            zq_t = zq_t + onehot_t[k:k + 1, :] * cb_t[:, k:k + 1]       # (E, tile)
    else:
        zq_t = jnp.dot(cb_t, onehot_t, preferred_element_type=jnp.float32)
    zqt_ref[...] = zq_t.astype(zqt_ref.dtype)                           # no transpose

    # Commitment-loss partial sum: sum_t ( min_k score_kt + |xp_t|^2 ),
    # with |xp_t|^2 = x_t^T (P P^T) x_t  -- no zq/xp difference needed.
    xg_t = jnp.dot(g, x_t, preferred_element_type=jnp.float32)          # (D, tile)
    xp_sq = jnp.sum(x_t * xg_t, axis=0, keepdims=True)                  # (1, tile)
    per_tok = jnp.maximum(min_s + xp_sq, 0.0)                           # (1, tile)
    loss_ref[...] = jnp.sum(per_tok, axis=1, keepdims=True)             # (1, 1)


@functools.partial(jax.jit, static_argnames=("token_tile",))
def random_vq_forward(x, rand_projs, codebook, *, token_tile=8192):
    """Pallas implementation of Random_VQ.forward (inference path, norm=False).

    x:          (B, N, D) float32
    rand_projs: (D, E)    float32   (num_codebooks == 1, already squeezed)
    codebook:   (K, E)    float32   (frozen euclidean codebook)

    returns z_q (B, N, E), indices (B, N) int32, loss_z_q scalar
    """
    B, N, D = x.shape
    E = rand_projs.shape[-1]
    K = codebook.shape[0]
    tokens = B * N

    # --- tile selection ------------------------------------------------------
    tile = min(token_tile, tokens)
    # Prefer >= 2 grid steps so dimension_semantics=("parallel",) can split the
    # grid across both v7x TensorCores (a single-tile launch idles one TC).
    if tile == tokens and tokens % 256 == 0:
        tile = tokens // 2
    assert tokens % tile == 0, "pad tokens to a multiple of the token tile"
    assert tile % 8 == 0, "token tile must be a multiple of 8"
    assert tile == tokens or tile % 128 == 0, \
        "multi-tile runs need a tile that is a multiple of 128"
    num_tiles = tokens // tile

    # --- wrapper-side layout & hoisted algebra (review opts 1/2/3) ----------
    # Tokens go on the lane axis inside the kernel: this single XLA transpose
    # replaces a per-tile Mosaic relayout of x and removes the 8x lane padding
    # of (tile, D) VMEM blocks.  Callers that can hand in x channel-major (and
    # consume z_q channel-major) skip both wrapper transposes entirely.
    x_t = jnp.transpose(x.reshape(tokens, D))                   # (D, tokens)
    proj = rand_projs.reshape(D, E).astype(jnp.float32)
    cbf = codebook.astype(jnp.float32)
    pc_t = jnp.dot(cbf, proj.T)                                 # (K, D) = (P @ C^T)^T
    cb_t = jnp.transpose(cbf)                                   # (E, K)
    g = jnp.dot(proj, proj.T)                                   # (D, D) = P @ P^T
    c_sq = jnp.sum(cbf * cbf, axis=-1, keepdims=True)           # (K, 1)

    zq_t, idx_row, loss_parts = pl.pallas_call(
        _random_vq_kernel,
        out_shape=(
            jax.ShapeDtypeStruct((E, tokens), x.dtype),          # z_q^T (lane-dense)
            jax.ShapeDtypeStruct((1, tokens), jnp.int32),        # indices (lane-dense)
            jax.ShapeDtypeStruct((num_tiles, 1, 1), jnp.float32) # per-tile loss partials
        ),
        grid_spec=pltpu.PrefetchScalarGridSpec(
            num_scalar_prefetch=0,
            grid=(num_tiles,),
            in_specs=[
                pl.BlockSpec((D, tile), lambda i: (0, i)),       # x^T tile (tokens on lanes)
                pl.BlockSpec((K, D), lambda i: (0, 0)),          # C @ P^T
                pl.BlockSpec((E, K), lambda i: (0, 0)),          # codebook^T
                pl.BlockSpec((D, D), lambda i: (0, 0)),          # P @ P^T
                pl.BlockSpec((K, 1), lambda i: (0, 0)),          # |c_k|^2
            ],
            out_specs=[
                pl.BlockSpec((E, tile), lambda i: (0, i)),       # z_q^T
                pl.BlockSpec((1, tile), lambda i: (0, i)),       # indices
                pl.BlockSpec((None, 1, 1), lambda i: (i, 0, 0)), # loss partial
            ],
        ),
        compiler_params=pltpu.CompilerParams(
            dimension_semantics=("parallel",),   # every tile is independent
        ),
    )(x_t, pc_t, cb_t, g, c_sq)

    # Layout plumbing back to the module's (B, N, E) contract (review opt 1).
    z_q = jnp.transpose(zq_t).reshape(B, N, E).astype(x.dtype)
    indices = idx_row.reshape(B, N)
    loss_z_q = jnp.sum(loss_parts) / jnp.float32(tokens * E)     # mean-reduced MSE
    return z_q, indices, loss_z_q


def _reference_forward(x, rand_projs, codebook):
    """Pure-JAX reference for the same semantics."""
    xp = jnp.einsum("bnd,de->bne", x, rand_projs)
    d = (jnp.sum(xp * xp, -1, keepdims=True)
         - 2.0 * jnp.einsum("bne,ke->bnk", xp, codebook)
         + jnp.sum(codebook * codebook, -1)[None, None, :])
    idx = jnp.argmin(d, axis=-1)
    zq = codebook[idx]
    loss = jnp.mean((zq - xp) ** 2)
    return zq, idx.astype(jnp.int32), loss


if __name__ == "__main__":
    def make_inputs(key, B, N, dim, codebook_dim, codebook_size, num_codebooks=1):
        kx, kp, kc = jax.random.split(key, 3)
        x = jax.random.normal(kx, (B, N, dim), dtype=jnp.float32)
        # xavier_normal_ init: std = sqrt(2 / (fan_in + fan_out))
        xavier_std = (2.0 / (dim + codebook_dim)) ** 0.5
        rand_projs = (xavier_std * jax.random.normal(
            kp, (num_codebooks, dim, codebook_dim), dtype=jnp.float32)
        ).reshape(dim, codebook_dim)
        # frozen euclidean codebook (uniform init, deterministic)
        bound = 1.0 / (codebook_dim ** 0.5)
        codebook = jax.random.uniform(kc, (codebook_size, codebook_dim),
                                      minval=-bound, maxval=bound,
                                      dtype=jnp.float32)
        return x, rand_projs, codebook

    key = jax.random.PRNGKey(0)
    k1, k2 = jax.random.split(key)

    # 1) module defaults: dim=16, codebook_dim=16, codebook_size=2
    #    (256 tokens -> auto-split into 2 tiles, exercises the parallel grid
    #     and the K<=2 VPU gather path)
    B, N = 2, 128
    x, rand_projs, codebook = make_inputs(k1, B, N, 16, 16, 2)
    z_ref, i_ref, l_ref = _reference_forward(x, rand_projs, codebook)

    z_q, indices, loss = random_vq_forward(x, rand_projs, codebook)
    jax.block_until_ready((z_q, indices, loss))
    assert z_q.shape == (B, N, 16)
    assert indices.shape == (B, N)
    assert jnp.allclose(z_q, z_ref, atol=1e-5), "z_q mismatch (defaults)"
    assert jnp.all(indices == i_ref), "indices mismatch (defaults)"
    assert jnp.allclose(loss, l_ref, atol=1e-5), "loss mismatch (defaults)"

    # 2) asymmetric dims + larger codebook, explicit multi-tile grid
    #    (exercises the MXU onehot @ codebook gather path and D != E)
    B2, N2 = 2, 384
    x2, rp2, cb2 = make_inputs(k2, B2, N2, 16, 24, 16)
    z_ref2, i_ref2, l_ref2 = _reference_forward(x2, rp2, cb2)

    z_q2, indices2, loss2 = random_vq_forward(x2, rp2, cb2, token_tile=256)
    jax.block_until_ready((z_q2, indices2, loss2))
    assert z_q2.shape == (B2, N2, 24)
    assert jnp.allclose(z_q2, z_ref2, atol=1e-5), "z_q mismatch (K=16)"
    assert jnp.all(indices2 == i_ref2), "indices mismatch (K=16)"
    assert jnp.allclose(loss2, l_ref2, atol=1e-5), "loss mismatch (K=16)"

    print("KERNEL_OK")
</pallas_src>

<mosaic_0001>
module attributes {stable_mosaic.version = 11 : i64} {
  func.func @_random_vq_kernel(%arg0: i32, %arg1: memref<16x128xf32, #tpu.memory_space<vmem>>, %arg2: memref<2x16xf32, #tpu.memory_space<vmem>>, %arg3: memref<16x2xf32, #tpu.memory_space<vmem>>, %arg4: memref<16x16xf32, #tpu.memory_space<vmem>>, %arg5: memref<2x1xf32, #tpu.memory_space<vmem>>, %arg6: memref<16x128xf32, #tpu.memory_space<vmem>>, %arg7: memref<1x128xi32, #tpu.memory_space<vmem>>, %arg8: memref<1x1x1xf32, #tpu.memory_space<vmem>>) attributes {dimension_semantics = [#tpu.dimension_semantics<parallel>], iteration_bounds = array<i64: 2>, scalar_prefetch = 0 : i64, scratch_operands = 0 : i64, tpu.core_type = #tpu.core_type<tc>, window_params = [{transform_indices = @transform_0, window_bounds = array<i64: 16, 128>}, {pipeline_mode = #tpu.pipeline_mode<synchronous>, transform_indices = @transform_1, window_bounds = array<i64: 2, 16>}, {pipeline_mode = #tpu.pipeline_mode<synchronous>, transform_indices = @transform_2, window_bounds = array<i64: 16, 2>}, {pipeline_mode = #tpu.pipeline_mode<synchronous>, transform_indices = @transform_3, window_bounds = array<i64: 16, 16>}, {pipeline_mode = #tpu.pipeline_mode<synchronous>, transform_indices = @transform_4, window_bounds = array<i64: 2, 1>}, {transform_indices = @transform_5, window_bounds = array<i64: 16, 128>}, {transform_indices = @transform_6, window_bounds = array<i64: 1, 128>}, {transform_indices = @transform_7, window_bounds = array<i64: 1, 1, 1>}]} {
    %c0 = arith.constant 0 : index
    %c0_0 = arith.constant 0 : index
    %0 = vector.load %arg1[%c0, %c0_0] : memref<16x128xf32, #tpu.memory_space<vmem>>, vector<16x128xf32>
    %c0_1 = arith.constant 0 : index
    %c0_2 = arith.constant 0 : index
    %1 = vector.load %arg2[%c0_1, %c0_2] : memref<2x16xf32, #tpu.memory_space<vmem>>, vector<2x16xf32>
    %c0_3 = arith.constant 0 : index
    %c0_4 = arith.constant 0 : index
    %2 = vector.load %arg3[%c0_3, %c0_4] : memref<16x2xf32, #tpu.memory_space<vmem>>, vector<16x2xf32>
    %c0_5 = arith.constant 0 : index
    %c0_6 = arith.constant 0 : index
    %3 = vector.load %arg4[%c0_5, %c0_6] : memref<16x16xf32, #tpu.memory_space<vmem>>, vector<16x16xf32>
    %c0_7 = arith.constant 0 : index
    %c0_8 = arith.constant 0 : index
    %4 = vector.load %arg5[%c0_7, %c0_8] : memref<2x1xf32, #tpu.memory_space<vmem>>, vector<2x1xf32>
    %cst = arith.constant dense<0.000000e+00> : vector<2x128xf32>
    %5 = tpu.matmul %1, %0, %cst {dimension_numbers = #tpu.dot_dimension_numbers<[1], [0], [0], [1], [0, 0, 1, 1], [], []>} : vector<2x16xf32>, vector<16x128xf32>, vector<2x128xf32> -> vector<2x128xf32>
    %cst_9 = arith.constant 2.000000e+00 : f32
    %6 = vector.broadcast %cst_9 : f32 to vector<2x128xf32>
    %7 = arith.mulf %6, %5 : vector<2x128xf32>
    %8 = vector.broadcast %4 : vector<2x1xf32> to vector<2x128xf32>
    %9 = arith.subf %8, %7 : vector<2x128xf32>
    %cst_10 = arith.constant dense<0x7F800000> : vector<128xf32>
    %10 = vector.multi_reduction <minimumf>, %9, %cst_10 [0] : vector<2x128xf32> to vector<128xf32>
    %11 = vector.shape_cast %10 : vector<128xf32> to vector<1x128xf32>
    %12 = tpu.iota {dimensions = array<i32: 0>} : vector<2x128xi32>
    %13 = vector.broadcast %11 : vector<1x128xf32> to vector<2x128xf32>
    %14 = arith.cmpf ole, %9, %13 : vector<2x128xf32>
    %c1_i32 = arith.constant 1 : i32
    %15 = vector.broadcast %c1_i32 : i32 to vector<2x128xi32>
    %16 = arith.select %14, %12, %15 : vector<2x128xi1>, vector<2x128xi32>
    %cst_11 = arith.constant dense<2147483647> : vector<128xi32>
    %17 = vector.multi_reduction <minsi>, %16, %cst_11 [0] : vector<2x128xi32> to vector<128xi32>
    %18 = vector.shape_cast %17 : vector<128xi32> to vector<1x128xi32>
    %c0_12 = arith.constant 0 : index
    %c0_13 = arith.constant 0 : index
    %19 = vector.load %arg7[%c0_12, %c0_13] : memref<1x128xi32, #tpu.memory_space<vmem>>, vector<1x128xi32>
    tpu.vector_store %arg7[%c0_12, %c0_13], %18 {strides = array<i32>} : memref<1x128xi32, #tpu.memory_space<vmem>>, vector<1x128xi32>,
    %20 = vector.broadcast %18 : vector<1x128xi32> to vector<2x128xi32>
    %21 = arith.cmpi eq, %12, %20 : vector<2x128xi32>
    %22 = arith.extui %21 : vector<2x128xi1> to vector<2x128xi32>
    %23 = arith.sitofp %22 : vector<2x128xi32> to vector<2x128xf32>
    %24 = vector.extract_strided_slice %23 {offsets = [0, 0], sizes = [1, 128], strides = [1, 1]} : vector<2x128xf32> to vector<1x128xf32>
    %25 = vector.extract_strided_slice %2 {offsets = [0, 0], sizes = [16, 1], strides = [1, 1]} : vector<16x2xf32> to vector<16x1xf32>
    %26 = vector.broadcast %24 : vector<1x128xf32> to vector<16x128xf32>
    %27 = vector.broadcast %25 : vector<16x1xf32> to vector<16x128xf32>
    %28 = arith.mulf %26, %27 : vector<16x128xf32>
    %29 = vector.extract_strided_slice %23 {offsets = [1, 0], sizes = [1, 128], strides = [1, 1]} : vector<2x128xf32> to vector<1x128xf32>
    %30 = vector.extract_strided_slice %2 {offsets = [0, 1], sizes = [16, 1], strides = [1, 1]} : vector<16x2xf32> to vector<16x1xf32>
    %31 = vector.broadcast %29 : vector<1x128xf32> to vector<16x128xf32>
    %32 = vector.broadcast %30 : vector<16x1xf32> to vector<16x128xf32>
    %33 = arith.mulf %31, %32 : vector<16x128xf32>
    %34 = arith.addf %28, %33 : vector<16x128xf32>
    %c0_14 = arith.constant 0 : index
    %c0_15 = arith.constant 0 : index
    %35 = vector.load %arg6[%c0_14, %c0_15] : memref<16x128xf32, #tpu.memory_space<vmem>>, vector<16x128xf32>
    tpu.vector_store %arg6[%c0_14, %c0_15], %34 {strides = array<i32>} : memref<16x128xf32, #tpu.memory_space<vmem>>, vector<16x128xf32>,
    %cst_16 = arith.constant dense<0.000000e+00> : vector<16x128xf32>
    %36 = tpu.matmul %3, %0, %cst_16 {dimension_numbers = #tpu.dot_dimension_numbers<[1], [0], [0], [1], [0, 0, 1, 1], [], []>} : vector<16x16xf32>, vector<16x128xf32>, vector<16x128xf32> -> vector<16x128xf32>
    %37 = arith.mulf %0, %36 : vector<16x128xf32>
    %cst_17 = arith.constant dense<0.000000e+00> : vector<128xf32>
    %38 = vector.multi_reduction <add>, %37, %cst_17 [0] : vector<16x128xf32> to vector<128xf32>
    %39 = vector.shape_cast %38 : vector<128xf32> to vector<1x128xf32>
    %40 = arith.addf %11, %39 : vector<1x128xf32>
    %cst_18 = arith.constant 0.000000e+00 : f32
    %41 = vector.broadcast %cst_18 : f32 to vector<1x128xf32>
    %42 = arith.maximumf %40, %41 : vector<1x128xf32>
    %cst_19 = arith.constant dense<0.000000e+00> : vector<1xf32>
    %43 = vector.multi_reduction <add>, %42, %cst_19 [1] : vector<1x128xf32> to vector<1xf32>
    %44 = vector.shape_cast %43 : vector<1xf32> to vector<1x1xf32>
    %c0_20 = arith.constant 0 : index
    %c0_21 = arith.constant 0 : index
    %c0_22 = arith.constant 0 : index
    %45 = vector.load %arg8[%c0_20, %c0_21, %c0_22] : memref<1x1x1xf32, #tpu.memory_space<vmem>>, vector<1x1x1xf32>
    %46 = vector.shape_cast %45 : vector<1x1x1xf32> to vector<1x1xf32>
    %47 = vector.shape_cast %44 : vector<1x1xf32> to vector<1x1x1xf32>
    tpu.vector_store %arg8[%c0_20, %c0_21, %c0_22], %47 {strides = array<i32>} : memref<1x1x1xf32, #tpu.memory_space<vmem>>, vector<1x1x1xf32>,
    return
  }
  func.func @transform_0(%arg0: i32) -> (i32, i32) {
    %c0_i32 = arith.constant 0 : i32
    %c0_i32_0 = arith.constant 0 : i32
    return %c0_i32, %arg0 : i32, i32
  }
  func.func @transform_1(%arg0: i32) -> (i32, i32) {
    %c0_i32 = arith.constant 0 : i32
    %c0_i32_0 = arith.constant 0 : i32
    %c0_i32_1 = arith.constant 0 : i32
    return %c0_i32, %c0_i32_0 : i32, i32
  }
  func.func @transform_2(%arg0: i32) -> (i32, i32) {
    %c0_i32 = arith.constant 0 : i32
    %c0_i32_0 = arith.constant 0 : i32
    %c0_i32_1 = arith.constant 0 : i32
    return %c0_i32, %c0_i32_0 : i32, i32
  }
  func.func @transform_3(%arg0: i32) -> (i32, i32) {
    %c0_i32 = arith.constant 0 : i32
    %c0_i32_0 = arith.constant 0 : i32
    %c0_i32_1 = arith.constant 0 : i32
    return %c0_i32, %c0_i32_0 : i32, i32
  }
  func.func @transform_4(%arg0: i32) -> (i32, i32) {
    %c0_i32 = arith.constant 0 : i32
    %c0_i32_0 = arith.constant 0 : i32
    %c0_i32_1 = arith.constant 0 : i32
    return %c0_i32, %c0_i32_0 : i32, i32
  }
  func.func @transform_5(%arg0: i32) -> (i32, i32) {
    %c0_i32 = arith.constant 0 : i32
    %c0_i32_0 = arith.constant 0 : i32
    return %c0_i32, %arg0 : i32, i32
  }
  func.func @transform_6(%arg0: i32) -> (i32, i32) {
    %c0_i32 = arith.constant 0 : i32
    %c0_i32_0 = arith.constant 0 : i32
    return %c0_i32, %arg0 : i32, i32
  }
  func.func @transform_7(%arg0: i32) -> (i32, i32, i32) {
    %c0_i32 = arith.constant 0 : i32
    %c0_i32_0 = arith.constant 0 : i32
    %c0_i32_1 = arith.constant 0 : i32
    return %arg0, %c0_i32, %c0_i32_0 : i32, i32, i32
  }
}

</mosaic_0001>

<bundles_post_ra>
// kernel: random_vq_forward.1
= control target key start
LH: loop header
LB: loop body
LE: loop exit
PB: predicated region body
PF: predicated region fallthrough
CT: control target
= control target key end

     0   :  { %13 = vsyncpa [#allocation5], 0  ;;  %s1092_s0 = inlined_call_operand.vmem [shape: f32[16,256], index: 0, kind: input, shape index: {}]   ;;  %s1093_s1 = inlined_call_operand.vmem [shape: f32[2,16], index: 1, kind: input, shape index: {}]   ;;  %s1094_s2 = inlined_call_operand.vmem [shape: f32[16,2], index: 2, kind: input, shape index: {}]   ;;  %s1095_s3 = inlined_call_operand.vmem [shape: f32[16,16], index: 3, kind: input, shape index: {}]   ;;  %s1096_s4 = inlined_call_operand.vmem [shape: f32[2,1], index: 4, kind: input, shape index: {}]   ;;  %s1097_s5 = inlined_call_operand.vmem [shape: f32[16,256], index: 5, kind: output, shape index: {0}]   ;;  %s1098_s6 = inlined_call_operand.hbm [shape: s32[1,256], index: 6, kind: output, shape index: {1}]   ;;  %s1099_s7 = inlined_call_operand.vmem [shape: f32[2,1,1], index: 7, kind: output, shape index: {2}]  }
   0x1   :  { %15 = vsyncpa [#allocation5 + $0x1], 0  ;;  %s949_s24 = smov 0   ;;  %s951_s25 = smov 0  }
   0x2   :  { %s953_s26 = smov 0   ;;  %s955_s27 = smov 0  }
   0x3 LB: > { %s970_s28 = sadd.s32 4294967295, %s901_s27   ;;  %s746_s29 = sadd.s32 4294967294, %s901_s27   ;;  %s901_s27 = sphi %s955_s27, %s1107_s27   ;;  %s897_s26 = sphi %s953_s26, %s1106_s26   ;;  %s893_s25 = sphi %s951_s25, %s1105_s25   ;;  %s889_s24 = sphi %s949_s24, %s1104_s24  }
   0x4   : > { %s974_s30 = sadd.s32 1, %s901_s27   ;;  %s28_s8 = sadd.s32 1, %s897_s26 }
   0x5   : > { %s25_s9 = ssub.s32 %s901_s27, %s974_s30  ;;  %p35_p0 = scmp.ne.s32.totalorder %s897_s26, %s893_s25 }
   0x6   : > { %p26_p1 = scmp.eq.s32.totalorder %s25_s9, 0  ;;  %p36_p2 = scmp.eq.s32.totalorder %s901_s27, 0 }
   0x7   : > { %p149_p3 = scmp.eq.s32.totalorder %s970_s28, 1  ;;  %p180_p4 = scmp.ne.s32.totalorder %s893_s25, %s889_s24 }
   0x8   : > { %s986_s10 = scalar_select %p26_p1, %s897_s26, %s28_s8  }
   0x9   : > { %p37_p5 = por %p36_p2, %p35_p0  ;;  %p988_p6 = por %p149_p3, %p35_p0 }
   0xa   : > { %p181_p7 = scmp.eq.s32.totalorder %s746_s29, 1  ;;  %p1100_p9 = scmp.ge.s32.totalorder %s901_s27, 2 }
   0xc   : > { %p992_p8 = por %p181_p7, %p180_p4  ;;  %235 = sbr.rel (%p1100_p9) target bundleno = 26 (0x1a), region = 32 }
  0x13   : > { %238 = sbr.rel (!%p37_p5) target bundleno = 26 (0x1a), region = 36  ;;  %s240_s13 = sand.u32 (%p37_p5), 1, %s897_s26  }
  0x14   : > { %s750_s14 = sshll.u32 (%p37_p5), %s901_s27, 3  ;;  %s749_s15 = sshll.u32 (%p37_p5), %s240_s13, 4 }
  0x15   : > { %s244_s18 = scalar_lea.vmem (%p37_p5), %s1092_s0, %s750_s14  ;;  %s242_s19 = scalar_lea.vmem (%p37_p5), [#allocation2], %s749_s15 }
  0x16   : > { %v274_v0 = vld [vmem:[%s244_s18] sm:$0xff] (%p37_p5)  ;;  %v276_v1 = vld [vmem:[%s244_s18 + $0x10] sm:$0xff] (%p37_p5) }
  0x17   : > { %275 = vst [vmem:[%s242_s19] sm:$0xff] (%p37_p5), %v274_v0  ;;  %277 = vst [vmem:[%s242_s19 + $0x8] sm:$0xff] (%p37_p5), %v276_v1 }
  0x1a PF: > { %p751_p10 = scmp.ge.s32.totalorder %s901_s27, 1  ;;  %p282_p11 = scmp.lt.s32.totalorder %s901_s27, 3 }
  0x1c   : > { %p283_p12 = pnand %p751_p10, %p282_p11 }
  0x1d   : > { %s1007_s20 = sand.u32 (!%p283_p12), 1, %s893_s25   ;;  %v903_v2 = vmov (!%p283_p12), 0.0|0.0   ;;  %vm904_vm0 = vmmov (!%p283_p12), 0   ;;  %v905_v3 = vmov (!%p283_p12), 0.0   ;;  %vm337_vm1 = vcmask (!%p283_p12), 130048   ;;  %v334_v4 = vld [vmem:[%s1095_s3] sm:$0xff] (!%p283_p12) }
  0x1e   : > { %286 = sbr.rel (%p283_p12) target bundleno = 439 (0x1b7), region = 74  ;;  %784 = vmatprep.subr.bf16.mxu0 (!%p283_p12), %v903_v2  ;;  %s752_s21 = sshll.u32 (!%p283_p12), %s1007_s20, 4  ;;  %774 = vmatprep.mubr.msk.f32.mxu0 (!%p283_p12), %vm904_vm0, %v905_v3  ;;  %v906_v5 = vmov (!%p283_p12), 0   ;;  %v336_v6 = vld [vmem:[%s1096_s4] sm:$0x3] (!%p283_p12)  ;;  %v333_v11 = vld [vmem:[%s1094_s2 + $0x8] sm:$0xff] (!%p283_p12)  ;;  %v426_v31 = vlaneseq (!%p283_p12) }
  0x1f   : > { %781 = vmatprep.mubr.msk.f32.mxu1 (!%p283_p12), %vm337_vm1, %v334_v4  ;;  %835 = vset.pattern.permute.xlu0 (!%p283_p12), %v906_v5  ;;  %v332_v7 = vld [vmem:[%s1094_s2] sm:$0xff] (!%p283_p12)  ;;  %s291_s14 = scalar_lea.vmem (!%p283_p12), [#allocation2], %s752_s21  ;;  %v335_v13 = vld [vmem:[%s1095_s3 + $0x8] sm:$0xff] (!%p283_p12)  ;;  %v907_v14 = vmov (!%p283_p12), 1   ;;  %vm418_vm2 = vcmask (!%p283_p12), 1041408   ;;  %s320_s23 = scalar_lea.vmem (!%p283_p12), [#allocation4], %s1007_s20 }
  0x20   : > { %v329_v8 = vld [vmem:[%s291_s14] sm:$0xff] (!%p283_p12)  ;;  %v330_v9 = vld [vmem:[%s291_s14 + $0x8] sm:$0xff] (!%p283_p12)  ;;  %414 = vperm.xlu0 (!%p283_p12), %835, %v336_v6   ;;  %836 = vset.pattern.permute.xlu1 (!%p283_p12), %v906_v5  ;;  %v427_v36 = vshrl.u32 (!%p283_p12), %v426_v31, 7  ;;  %s314_s29 = scalar_lea.vmem (!%p283_p12), [#allocation3], %s752_s21  ;;  %p326_p13 = scmp.lt.s32.totalorder (!%p283_p12), %s970_s28, 1  ;;  %vm572_vm8 = vcmask (!%p283_p12), 0  }
  0x21   : > { %v785_v10 = vpack.c.bf16 (!%p283_p12), %v330_v9, %v329_v8  ;;  %450 = vperm.xlu1 (!%p283_p12), %836, %v332_v7   ;;  %v331_v12 = vld [vmem:[%s1093_s1] sm:$0x3] (!%p283_p12)  ;;  %s579_s15 = scalar_lea.sflag (!%p283_p12), [#allocation5], %s1007_s20 }
  0x22   : > { %v446_v52 = vsub.s32 (!%p283_p12), 0, %v427_v36  ;;  %v462_v53 = vsub.s32 (!%p283_p12), 1, %v427_v36 }
  0x23   : > { %786 = vmatpush3.bf16.msra.mxu0 (!%p283_p12), %v785_v10  ;;  %788 = vmatprep.subr.bf16.mxu1 (!%p283_p12), %v785_v10 }
  0x24   : > { %790 = vmatpush3.bf16.msra.mxu1 (!%p283_p12), %v785_v10  ;;  %838 = vset.pattern.permute.xlu0 (!%p283_p12), %v907_v14 }
  0x25   : > { %455 = vperm.xlu1 %836, %v333_v11   ;;  %s327_s8 = scalar_select %p326_p13, %s970_s28, 1 }
  0x26   : > { %775 = vmatmul.mubr.msk.f32.vlgmr.msra.gmra.mrb[0].mxu0 %vm337_vm1, %v331_v12  ;;  %s759_s16 = sshll.u32 (%p988_p6), %s970_s28, 3 }
  0x27   : > { %782 = vmatmul.mubr.msk.f32.vlgmr.msra.gmra.mrb[0].mxu1 %vm337_vm1, %v335_v13  ;;  %s328_s14 = scalar_lea.vmem %s1099_s7, %s327_s8  ;;  %s589_s18 = scalar_lea.vmem (%p988_p6), %s1097_s5, %s759_s16 }
  0x29   : > { %837 = vset.pattern.permute.xlu1 %v907_v14 }
  0x2a   : > { %465 = vperm.xlu1 %837, %v332_v7  }
  0x2e   : > { %469 = vperm.xlu1 %837, %v333_v11  }
  0x9f   : > { %v415_v16 = vpop.permute.xlu0 %414 }
  0xa0   : > { %v451_v39 = vpop.permute.xlu1 %450 }
  0xa4   : > { %v456_v46 = vpop.permute.xlu1 %455 }
  0xa9   : > { %v466_v50 = vpop.permute.xlu1 %465 }
  0xad   : > { %v470_v56 = vpop.permute.xlu1 %469 }
  0xf9   : > { %v407_v15 = vpop.f32.mrb[0].mxu0 }
  0xfa   : > { %v411_v17 = vmul.f32 2.0, %v407_v15  ;;  %v776_v18 = vpop.f32.mrb[1].mxu0  ;;  %v783_v19 = vpop.f32.mrb[0].mxu1 }
  0xfb   : > { %v560_v20 = vmul.f32 %v783_v19, %v330_v9  ;;  %v550_v21 = vpop.f32.mrb[1].mxu1 }
  0xfc   : > { %v417_v22 = vsub.f32 %v415_v16, %v411_v17  ;;  %v559_v23 = vmul.f32 %v550_v21, %v329_v8 }
  0xfe   : > { %v419_v24 = vsel %vm418_vm2, %v417_v22, inf  ;;  %v561_v25 = vadd.f32 %v560_v20, %v559_v23 }
  0xff   : > { %v420_v26 = vrot.slane %v419_v24, 4 }
 0x100   : > { %v562_v27 = vrot.slane %v561_v25, 4 }
 0x101   : > { %v421_v28 = vmin.f32 %v419_v24, %v420_v26 }
 0x102   : > { %v563_v29 = vadd.f32 %v562_v27, %v561_v25 }
 0x103   : > { %v422_v30 = vrot.slane %v421_v28, 2 }
 0x104   : > { %v564_v32 = vrot.slane %v563_v29, 2 }
 0x105   : > { %v423_v33 = vmin.f32 %v421_v28, %v422_v30 }
 0x106   : > { %v565_v34 = vadd.f32 %v564_v32, %v563_v29 }
 0x107   : > { %v424_v35 = vrot.slane %v423_v33, 1 }
 0x108   : > { %v566_v37 = vrot.slane %v565_v34, 1 }
 0x109   : > { %v425_v38 = vmin.f32 %v423_v33, %v424_v35 }
 0x10a   : > { %v567_v40 = vadd.f32 %v566_v37, %v565_v34 }
 0x10b   : > { %vm428_vm3 = vcmp.le.f32.partialorder %v417_v22, %v425_v38 }
 0x10c   : > { %v429_v41 = vsel %vm428_vm3, %v427_v36, 1  ;;  %v568_v42 = vadd.f32 %v567_v40, %v425_v38 }
 0x10d   : > { %v430_v43 = vsel %vm418_vm2, %v429_v41, 2147483647 }
 0x10e   : > { %v431_v44 = vrot.slane %v430_v43, 4  ;;  %v569_v45 = vmax.f32 %v568_v42, 0.0 }
 0x110   : > { %vm432_vm4 = vcmp.lt.s32.totalorder %v430_v43, %v431_v44  ;;  %570 = vadd.xlane.f32.xlu0 %v569_v45 }
 0x111   : > { %v433_v47 = vsel %vm432_vm4, %v430_v43, %v431_v44 }
 0x112   : > { %v434_v48 = vrot.slane %v433_v47, 2 }
 0x114   : > { %vm435_vm5 = vcmp.lt.s32.totalorder %v433_v47, %v434_v48 }
 0x115   : > { %v436_v49 = vsel %vm435_vm5, %v433_v47, %v434_v48 }
 0x116   : > { %v437_v51 = vrot.slane %v436_v49, 1 }
 0x118   : > { %vm438_vm6 = vcmp.lt.s32.totalorder %v436_v49, %v437_v51 }
 0x119   : > { %v439_v54 = vsel %vm438_vm6, %v436_v49, %v437_v51 }
 0x11a   : > { %440 = vst [vmem:[%s320_s23] sm:$0x1] %v439_v54  ;;  %vm441_vm7 = vcmp.eq.s32.totalorder %v427_v36, %v439_v54 }
 0x11b   : > { %v755_v55 = vsel %vm441_vm7, 1.0, %v905_v3 }
 0x11c   : > { %v447_v57 = vrot.slane %v755_v55, %v446_v52  ;;  %v463_v58 = vrot.slane %v755_v55, %v462_v53 }
 0x11e   : > { %v458_v59 = vmul.f32 %v451_v39, %v447_v57  ;;  %v459_v60 = vmul.f32 %v456_v46, %v447_v57  ;;  %v472_v61 = vmul.f32 %v466_v50, %v463_v58  ;;  %v473_v62 = vmul.f32 %v470_v56, %v463_v58 }
 0x120   : > { %v474_v63 = vadd.f32 %v472_v61, %v458_v59  ;;  %v475_v0 = vadd.f32 %v473_v62, %v459_v60 }
 0x122   : > { %476 = vst [vmem:[%s314_s29] sm:$0xff] %v474_v63  ;;  %477 = vst [vmem:[%s314_s29 + $0x8] sm:$0xff] %v475_v0 }
 0x129   : > { %v619_v2 = vld [vmem:[%s314_s29] sm:$0xff] (%p988_p6)  ;;  %v621_v3 = vld [vmem:[%s314_s29 + $0x8] sm:$0xff] (%p988_p6) }
 0x12a   : > { %620 = vst [vmem:[%s589_s18] sm:$0xff] (%p988_p6), %v619_v2  ;;  %622 = vst [vmem:[%s589_s18 + $0x10] sm:$0xff] (%p988_p6), %v621_v3 }
 0x198   : > { %587 = sbr.rel (!%p988_p6) target bundleno = 415 (0x19f), region = 82 }
 0x19d   : > { %v571_v1 = vpop.xlane.xlu0 %570 }
 0x19e   : > { %573 = vst.msk [vmem:[%s328_s14] sm:$0x1] %vm572_vm8, %v571_v1 }
 0x19f PF: > { %s760_s19 = sshll.u32 %s970_s28, 4  ;;  %s635_s22 = sshll.u32 %s320_s23, 4  ;;  %s636_s22 = int_to_ptr.vmem [resolvable:$true] %s635_s22 }
 0x1a0   : > { %s633_s13 = scalar_lea.hbm %s1098_s6, %s760_s19  ;;  %s839_s14 = scalar_lea.vmem %s636_s22, 16 }
 0x1a1   : > { %p840_p0 = scmp.ne.s32.totalorder %s636_s22, %s839_s14  ;;  %s908_s29 = smov [#allocation4]  }
 0x1a2   : > { %s843_s16 = sshll.u32 %s908_s29, 4  ;;  %s844_s16 = int_to_ptr.vmem [resolvable:$false] %s843_s16 }
 0x1a3   : > { %p841_p1 = pnand %p840_p0, %p988_p6  ;;  %s845_s21 = scalar_lea.vmem %s844_s16, 32 }
 0x1a4   : > { %p846_p3 = scmp.lt.s32.totalorder %s636_s22, %s844_s16  ;;  %p847_p4 = scmp.lt.s32.totalorder %s845_s21, %s839_s14 }
 0x1a5   : > { %p842_p2 = pneg %p841_p1 }
 0x1a6   : > { %p848_p5 = por %p847_p4, %p846_p3 }
 0x1a8   : > { %p849_p7 = pnand %p848_p5, %p842_p2 }
 0x1aa   : > { %852 = shalt.err (!%p849_p7)
}
 0x1ab   : > { %s853_s28 = scalar_lea.hbm %s633_s13, 16  ;;  %s857_s18 = scalar_lea.hbm %s1098_s6, 32 }
 0x1ac   : > { %p854_p10 = scmp.ne.s32.totalorder %s633_s13, %s853_s28  ;;  %p858_p13 = scmp.lt.u32.totalorder %s633_s13, %s1098_s6 }
 0x1ad   : > { %p859_p0 = scmp.lt.u32.totalorder %s857_s18, %s853_s28  ;;  %p861_p9 = scmp.lt.u32.totalorder %s853_s28, %s633_s13 }
 0x1ae   : > { %p855_p11 = pnand %p854_p10, %p988_p6 }
 0x1af   : > { %p860_p1 = por %p859_p0, %p858_p13 }
 0x1b0   : > { %p856_p12 = pneg %p855_p11 }
 0x1b1   : > { %p862_p3 = por %p861_p9, %p860_p1 }
 0x1b3   : > { %p863_p2 = pnand %p862_p3, %p856_p12 }
 0x1b5   : > { %866 = shalt.err (!%p863_p2)
}
 0x1b6   : > { %791 = dma.vmem_to_hbm [thread:$0]  (%p988_p6), %s636_s22, 16, %s633_s13, %s579_s15  }
 0x1b7 PF: > { %s657_s9 = sand.u32 1, %s889_s24   ;;  %p1103_p4 = scmp.ge.s32.totalorder %s901_s27, 2 }
 0x1b8   : > { %s658_s14 = scalar_lea.sflag [#allocation5], %s657_s9 }
 0x1b9   : > { %p794_p5 = pnand %p1103_p4, %p992_p8 }
 0x1bb   : > { %884 = dma.done.wait (!%p794_p5), %s658_s14, 16  }
 0x1bc   : > { %886 = vsyncadd (!%p794_p5), %s658_s14, 4294967280  ;;  %p18_p9 = scmp.ge.s32.totalorder %s974_s30, 4   ;;  %s1104_s24 = smov %s893_s25 }
 0x1bd   : > { %s1105_s25 = smov %s897_s26  ;;  %s1106_s26 = smov %s986_s10 }
 0x1be   : > { %s1107_s27 = smov %s974_s30  ;;  %20 = sbr.rel (!%p18_p9) target bundleno = 3 (0x3), region = 180 }
 0x1c5   :  { %668 = vsyncpa [#allocation5], 1 }
 0x1c6   :  { %670 = vsyncpa [#allocation5 + $0x1], 1 }

</bundles_post_ra>
